<compile_context>
chip_gen: v7x
topology: tpu7x:2x2x1
jax: 0.10.0
libtpu: 0.0.40
codegen_flags: <defaults>
</compile_context>

<pallas_src>
import jax
import jax.numpy as jnp
from jax.experimental import pallas as pl
from jax.experimental.pallas import tpu as pltpu

BN_EPS = 1e-5


# ----------------------------- kernel ---------------------------------------

def _fact_red_kernel(p0_ref, p1_ref, w0_ref, w1_ref, shift_ref, o_ref):
    """One (C, TS) spatial tile of one batch element: both 1x1 convs (BN folded)."""
    # p*_ref: (1, C, TS)   w*_ref: (c_half, C)   shift_ref: (2, c_half, 1)
    # o_ref : (1, 2, c_half, TS)
    y0 = jnp.dot(w0_ref[...], p0_ref[0], preferred_element_type=jnp.float32)
    y1 = jnp.dot(w1_ref[...], p1_ref[0], preferred_element_type=jnp.float32)
    o_ref[0, 0] = (y0 + shift_ref[0]).astype(o_ref.dtype)
    o_ref[0, 1] = (y1 + shift_ref[1]).astype(o_ref.dtype)


# ----------------------------- wrapper ---------------------------------------

def factorized_reduction(x, w0, w1, gamma, beta, run_mean, run_var, *, max_ts=512):
    """stride > 1 path. x: NCHW f32. w0/w1: (C_in, C_out//2). BN params: (C_out,)."""
    N, C, H, W = x.shape
    H2, W2 = (H + 1) // 2, (W + 1) // 2          # PyTorch AvgPool2d(1, 2) -> ceil
    c_half = w0.shape[1]
    c_out = 2 * c_half
    S = H2 * W2

    # Glue (XLA): stride-2 subsample of both paths, keeping NCHW order so no
    # transposes are needed — only strided slices + contiguous reshapes.
    p0 = x[:, :, ::2, ::2].reshape(N, C, S)
    p1 = jnp.pad(x, ((0, 0), (0, 0), (0, 1), (0, 1)))[:, :, 1::2, 1::2]
    p1 = p1.reshape(N, C, S)

    # Fold inference BatchNorm into the (c_half, C) conv weights; only shift left.
    scale = gamma * jax.lax.rsqrt(run_var + BN_EPS)            # (c_out,)
    shift = (beta - run_mean * scale).reshape(2, c_half, 1)    # per-path, per-channel
    w0k = (w0 * scale[:c_half][None, :]).T                     # (c_half, C)
    w1k = (w1 * scale[c_half:][None, :]).T                     # (c_half, C)

    # Spatial tiling: single full-S tile when small, else lane-dense 128-multiples.
    if S <= max_ts:
        ts, s_pad = S, S
    else:
        ts = max_ts                                            # multiple of 128
        s_pad = -(-S // ts) * ts
        p0 = jnp.pad(p0, ((0, 0), (0, 0), (0, s_pad - S)))
        p1 = jnp.pad(p1, ((0, 0), (0, 0), (0, s_pad - S)))
    grid = (N, s_pad // ts)

    out = pl.pallas_call(
        _fact_red_kernel,
        grid=grid,
        in_specs=[
            pl.BlockSpec((1, C, ts), lambda n, s: (n, 0, s)),          # path0 tile
            pl.BlockSpec((1, C, ts), lambda n, s: (n, 0, s)),          # path1 tile
            pl.BlockSpec((c_half, C), lambda n, s: (0, 0)),            # w0 (resident)
            pl.BlockSpec((c_half, C), lambda n, s: (0, 0)),            # w1 (resident)
            pl.BlockSpec((2, c_half, 1), lambda n, s: (0, 0, 0)),      # BN shift
        ],
        out_specs=pl.BlockSpec((1, 2, c_half, ts), lambda n, s: (n, 0, 0, s)),
        out_shape=jax.ShapeDtypeStruct((N, 2, c_half, s_pad), jnp.float32),
        compiler_params=pltpu.CompilerParams(
            dimension_semantics=("parallel", "parallel"),              # megacore on v7x
        ),
    )(p0, p1, w0k, w1k, shift)

    # (N, 2, c_half, s_pad) -> (N, c_out, H2, W2): contiguous reshape + slice only.
    return out.reshape(N, c_out, s_pad)[:, :, :S].reshape(N, c_out, H2, W2)


class IdentityOp:
    """Mirror of the PyTorch `Identity` module (inference semantics)."""

    def __init__(self, input_size, stride, out_channels, key):
        self.input_size = input_size
        self.stride = stride
        self.out_channels = out_channels
        if stride > 1:
            c_in = input_size[0]
            c_half = out_channels // 2
            k0, k1 = jax.random.split(key)
            std = 1.0 / (c_in ** 0.5)
            # Conv2d weight (c_half, c_in, 1, 1) stored transposed as (c_in, c_half).
            self.w0 = jax.random.normal(k0, (c_in, c_half), jnp.float32) * std
            self.w1 = jax.random.normal(k1, (c_in, c_half), jnp.float32) * std
            # BatchNorm2d default init / running stats (inference).
            self.gamma = jnp.ones((out_channels,), jnp.float32)
            self.beta = jnp.zeros((out_channels,), jnp.float32)
            self.run_mean = jnp.zeros((out_channels,), jnp.float32)
            self.run_var = jnp.ones((out_channels,), jnp.float32)
        else:
            self.w0 = None

    def __call__(self, x):
        if self.stride > 1:
            return factorized_reduction(x, self.w0, self.w1, self.gamma,
                                        self.beta, self.run_mean, self.run_var)
        # stride == 1: PyTorch forward returns x unchanged -> no kernel, no copy.
        return x


# ----------------------------- reference (plain JAX) -------------------------

def _ref_factorized_reduction(x, w0, w1, gamma, beta, mean, var):
    p0 = x[:, :, ::2, ::2]
    p1 = jnp.pad(x, ((0, 0), (0, 0), (0, 1), (0, 1)))[:, :, 1:, 1:][:, :, ::2, ::2]
    y0 = jnp.einsum("nchw,ck->nkhw", p0, w0)
    y1 = jnp.einsum("nchw,ck->nkhw", p1, w1)
    y = jnp.concatenate([y0, y1], axis=1)
    scale = (gamma / jnp.sqrt(var + BN_EPS)).reshape(1, -1, 1, 1)
    shift = (beta - mean * gamma / jnp.sqrt(var + BN_EPS)).reshape(1, -1, 1, 1)
    return y * scale + shift


# ----------------------------- main ------------------------------------------

if __name__ == "__main__":
    key = jax.random.PRNGKey(0)
    kx, kw = jax.random.split(key)

    N, C, H, W = 2, 4, 16, 16
    out_channels = 8
    x = jax.random.normal(kx, (N, C, H, W), jnp.float32)

    # stride > 1 -> FactorizedReduction (Pallas kernel)
    op_reduce = IdentityOp(input_size=(C, H, W), stride=2,
                           out_channels=out_channels, key=kw)
    y = jax.block_until_ready(op_reduce(x))
    assert y.shape == (N, out_channels, H // 2, W // 2), y.shape
    y_ref = _ref_factorized_reduction(x, op_reduce.w0, op_reduce.w1,
                                      op_reduce.gamma, op_reduce.beta,
                                      op_reduce.run_mean, op_reduce.run_var)
    assert jnp.allclose(y, y_ref, atol=1e-4, rtol=1e-4)

    # Odd spatial dims follow PyTorch's ceil semantics (path1 last row/col zero-padded).
    x_odd = jax.random.normal(kx, (N, C, 15, 15), jnp.float32)
    y_odd = jax.block_until_ready(op_reduce(x_odd))
    assert y_odd.shape == (N, out_channels, 8, 8), y_odd.shape
    y_odd_ref = _ref_factorized_reduction(x_odd, op_reduce.w0, op_reduce.w1,
                                          op_reduce.gamma, op_reduce.beta,
                                          op_reduce.run_mean, op_reduce.run_var)
    assert jnp.allclose(y_odd, y_odd_ref, atol=1e-4, rtol=1e-4)

    # stride == 1 -> pure pass-through (no kernel launched, matching PyTorch forward)
    op_id = IdentityOp(input_size=(C, H, W), stride=1, out_channels=C, key=kw)
    z = jax.block_until_ready(op_id(x))
    assert z.shape == x.shape
    assert jnp.allclose(z, x)

    print("KERNEL_OK")
</pallas_src>

<mosaic_0001>
module attributes {stable_mosaic.version = 11 : i64} {
  func.func @_fact_red_kernel(%arg0: i32, %arg1: i32, %arg2: memref<1x4x64xf32, #tpu.memory_space<vmem>>, %arg3: memref<1x4x64xf32, #tpu.memory_space<vmem>>, %arg4: memref<4x4xf32, #tpu.memory_space<vmem>>, %arg5: memref<4x4xf32, #tpu.memory_space<vmem>>, %arg6: memref<2x4x1xf32, #tpu.memory_space<vmem>>, %arg7: memref<1x2x4x64xf32, #tpu.memory_space<vmem>>) attributes {dimension_semantics = [#tpu.dimension_semantics<parallel>, #tpu.dimension_semantics<parallel>], iteration_bounds = array<i64: 2, 1>, scalar_prefetch = 0 : i64, scratch_operands = 0 : i64, tpu.core_type = #tpu.core_type<tc>, window_params = [{transform_indices = @transform_0, window_bounds = array<i64: 1, 4, 64>}, {transform_indices = @transform_1, window_bounds = array<i64: 1, 4, 64>}, {pipeline_mode = #tpu.pipeline_mode<synchronous>, transform_indices = @transform_2, window_bounds = array<i64: 4, 4>}, {pipeline_mode = #tpu.pipeline_mode<synchronous>, transform_indices = @transform_3, window_bounds = array<i64: 4, 4>}, {pipeline_mode = #tpu.pipeline_mode<synchronous>, transform_indices = @transform_4, window_bounds = array<i64: 2, 4, 1>}, {transform_indices = @transform_5, window_bounds = array<i64: 1, 2, 4, 64>}]} {
    %c0 = arith.constant 0 : index
    %c0_0 = arith.constant 0 : index
    %0 = vector.load %arg4[%c0, %c0_0] : memref<4x4xf32, #tpu.memory_space<vmem>>, vector<4x4xf32>
    %c0_1 = arith.constant 0 : index
    %c0_2 = arith.constant 0 : index
    %c0_3 = arith.constant 0 : index
    %1 = vector.load %arg2[%c0_1, %c0_2, %c0_3] : memref<1x4x64xf32, #tpu.memory_space<vmem>>, vector<1x4x64xf32>
    %2 = vector.shape_cast %1 : vector<1x4x64xf32> to vector<4x64xf32>
    %cst = arith.constant dense<0.000000e+00> : vector<4x64xf32>
    %3 = tpu.matmul %0, %2, %cst {dimension_numbers = #tpu.dot_dimension_numbers<[1], [0], [0], [1], [0, 0, 1, 1], [], []>} : vector<4x4xf32>, vector<4x64xf32>, vector<4x64xf32> -> vector<4x64xf32>
    %c0_4 = arith.constant 0 : index
    %c0_5 = arith.constant 0 : index
    %4 = vector.load %arg5[%c0_4, %c0_5] : memref<4x4xf32, #tpu.memory_space<vmem>>, vector<4x4xf32>
    %c0_6 = arith.constant 0 : index
    %c0_7 = arith.constant 0 : index
    %c0_8 = arith.constant 0 : index
    %5 = vector.load %arg3[%c0_6, %c0_7, %c0_8] : memref<1x4x64xf32, #tpu.memory_space<vmem>>, vector<1x4x64xf32>
    %6 = vector.shape_cast %5 : vector<1x4x64xf32> to vector<4x64xf32>
    %cst_9 = arith.constant dense<0.000000e+00> : vector<4x64xf32>
    %7 = tpu.matmul %4, %6, %cst_9 {dimension_numbers = #tpu.dot_dimension_numbers<[1], [0], [0], [1], [0, 0, 1, 1], [], []>} : vector<4x4xf32>, vector<4x64xf32>, vector<4x64xf32> -> vector<4x64xf32>
    %c0_10 = arith.constant 0 : index
    %c0_11 = arith.constant 0 : index
    %c0_12 = arith.constant 0 : index
    %8 = vector.load %arg6[%c0_10, %c0_11, %c0_12] : memref<2x4x1xf32, #tpu.memory_space<vmem>>, vector<1x4x1xf32>
    %9 = vector.shape_cast %8 : vector<1x4x1xf32> to vector<4x1xf32>
    %10 = vector.broadcast %9 : vector<4x1xf32> to vector<4x64xf32>
    %11 = arith.addf %3, %10 : vector<4x64xf32>
    %c0_13 = arith.constant 0 : index
    %c0_14 = arith.constant 0 : index
    %c0_15 = arith.constant 0 : index
    %c0_16 = arith.constant 0 : index
    %12 = vector.load %arg7[%c0_13, %c0_14, %c0_15, %c0_16] : memref<1x2x4x64xf32, #tpu.memory_space<vmem>>, vector<1x1x4x64xf32>
    %13 = vector.shape_cast %12 : vector<1x1x4x64xf32> to vector<4x64xf32>
    %14 = vector.shape_cast %11 : vector<4x64xf32> to vector<1x1x4x64xf32>
    tpu.vector_store %arg7[%c0_13, %c0_14, %c0_15, %c0_16], %14 {strides = array<i32>} : memref<1x2x4x64xf32, #tpu.memory_space<vmem>>, vector<1x1x4x64xf32>,
    %c1 = arith.constant 1 : index
    %c0_17 = arith.constant 0 : index
    %c0_18 = arith.constant 0 : index
    %15 = vector.load %arg6[%c1, %c0_17, %c0_18] : memref<2x4x1xf32, #tpu.memory_space<vmem>>, vector<1x4x1xf32>
    %16 = vector.shape_cast %15 : vector<1x4x1xf32> to vector<4x1xf32>
    %17 = vector.broadcast %16 : vector<4x1xf32> to vector<4x64xf32>
    %18 = arith.addf %7, %17 : vector<4x64xf32>
    %c0_19 = arith.constant 0 : index
    %c1_20 = arith.constant 1 : index
    %c0_21 = arith.constant 0 : index
    %c0_22 = arith.constant 0 : index
    %19 = vector.load %arg7[%c0_19, %c1_20, %c0_21, %c0_22] : memref<1x2x4x64xf32, #tpu.memory_space<vmem>>, vector<1x1x4x64xf32>
    %20 = vector.shape_cast %19 : vector<1x1x4x64xf32> to vector<4x64xf32>
    %21 = vector.shape_cast %18 : vector<4x64xf32> to vector<1x1x4x64xf32>
    tpu.vector_store %arg7[%c0_19, %c1_20, %c0_21, %c0_22], %21 {strides = array<i32>} : memref<1x2x4x64xf32, #tpu.memory_space<vmem>>, vector<1x1x4x64xf32>,
    return
  }
  func.func @transform_0(%arg0: i32, %arg1: i32) -> (i32, i32, i32) {
    %c0_i32 = arith.constant 0 : i32
    %c0_i32_0 = arith.constant 0 : i32
    return %arg0, %c0_i32, %arg1 : i32, i32, i32
  }
  func.func @transform_1(%arg0: i32, %arg1: i32) -> (i32, i32, i32) {
    %c0_i32 = arith.constant 0 : i32
    %c0_i32_0 = arith.constant 0 : i32
    return %arg0, %c0_i32, %arg1 : i32, i32, i32
  }
  func.func @transform_2(%arg0: i32, %arg1: i32) -> (i32, i32) {
    %c0_i32 = arith.constant 0 : i32
    %c0_i32_0 = arith.constant 0 : i32
    %c0_i32_1 = arith.constant 0 : i32
    return %c0_i32, %c0_i32_0 : i32, i32
  }
  func.func @transform_3(%arg0: i32, %arg1: i32) -> (i32, i32) {
    %c0_i32 = arith.constant 0 : i32
    %c0_i32_0 = arith.constant 0 : i32
    %c0_i32_1 = arith.constant 0 : i32
    return %c0_i32, %c0_i32_0 : i32, i32
  }
  func.func @transform_4(%arg0: i32, %arg1: i32) -> (i32, i32, i32) {
    %c0_i32 = arith.constant 0 : i32
    %c0_i32_0 = arith.constant 0 : i32
    %c0_i32_1 = arith.constant 0 : i32
    %c0_i32_2 = arith.constant 0 : i32
    return %c0_i32, %c0_i32_0, %c0_i32_1 : i32, i32, i32
  }
  func.func @transform_5(%arg0: i32, %arg1: i32) -> (i32, i32, i32, i32) {
    %c0_i32 = arith.constant 0 : i32
    %c0_i32_0 = arith.constant 0 : i32
    %c0_i32_1 = arith.constant 0 : i32
    return %arg0, %c0_i32, %c0_i32_0, %arg1 : i32, i32, i32, i32
  }
}

</mosaic_0001>

<bundles_post_ra>
// kernel: tpu_custom_call.1
= control target key start
LH: loop header
LB: loop body
LE: loop exit
PB: predicated region body
PF: predicated region fallthrough
CT: control target
= control target key end

     0   :  { %10 = vsyncpa [#allocation3], 0  ;;  %s1021_s0 = inlined_call_operand.vmem [shape: f32[2,4,64], index: 0, kind: input, shape index: {}]   ;;  %s1022_s1 = inlined_call_operand.hbm [shape: f32[2,4,64], index: 1, kind: input, shape index: {}]   ;;  %s1023_s2 = inlined_call_operand.vmem [shape: f32[4,4], index: 2, kind: input, shape index: {}]   ;;  %s1024_s3 = inlined_call_operand.vmem [shape: f32[4,4], index: 3, kind: input, shape index: {}]   ;;  %s1025_s4 = inlined_call_operand.vmem [shape: f32[2,4,1], index: 4, kind: input, shape index: {}]   ;;  %s1026_s5 = inlined_call_operand.hbm [shape: f32[2,2,4,64], index: 5, kind: output, shape index: {}]  }
   0x1   :  { %12 = vsyncpa [#allocation3 + $0x1], 0 }
   0x2   :  { %13 = vsyncpa [#allocation4], 0 }
   0x3   :  { %15 = vsyncpa [#allocation4 + $0x1], 0  ;;  %s829_s18 = smov 0   ;;  %s831_s19 = smov 0  }
   0x4   :  { %s833_s20 = smov 0   ;;  %s835_s21 = smov 0  }
   0x5   :  { %s837_s22 = smov 0   ;;  %s839_s23 = smov 0  }
   0x6 LB: > { %s574_s24 = sadd.s32 4294967295, %s790_s23   ;;  %s575_s25 = sadd.s32 4294967294, %s790_s23   ;;  %s790_s23 = sphi %s839_s23, %s21_s23   ;;  %s786_s22 = sphi %s837_s22, %s1042_s22   ;;  %s782_s21 = sphi %s835_s21, %s1041_s21   ;;  %s778_s20 = sphi %s833_s20, %s1040_s20   ;;  %s774_s19 = sphi %s831_s19, %s1039_s19   ;;  %s770_s18 = sphi %s829_s18, %s1038_s18  }
   0x7   : > { %s33_s26 = sadd.s32 1, %s786_s22  ;;  %s70_s27 = sadd.s32 1, %s778_s20 }
   0x8   : > { %p35_p0 = scmp.ge.s32.totalorder %s33_s26, 2  ;;  %p77_p1 = scmp.ne.s32.totalorder %s778_s20, %s774_s19 }
   0x9   : > { %p78_p2 = scmp.eq.s32.totalorder %s790_s23, 0  ;;  %p83_p3 = scmp.ne.s32.totalorder %s774_s19, %s770_s18 }
   0xa   : > { %s1044_s26 = smov (%p35_p0, %s33_s26), 0  ;;  %p84_p5 = scmp.eq.s32.totalorder %s574_s24, 0 }
   0xb   : > { %p870_p4 = por %p78_p2, %p77_p1  ;;  %s65_s29 = ssub.s32 %s786_s22, %s1044_s26 }
   0xc   : > { %p172_p6 = scmp.eq.s32.totalorder %s574_s24, 1  ;;  %p68_p7 = scmp.eq.s32.totalorder %s65_s29, 0 }
   0xd   : > { %p876_p8 = por %p84_p5, %p83_p3  ;;  %p178_p10 = scmp.eq.s32.totalorder %s575_s25, 1 }
   0xe   : > { %p880_p9 = por %p172_p6, %p77_p1  ;;  %p622_p13 = scmp.lt.s32.totalorder %s790_s23, 2 }
   0xf   : > { %s885_s7 = scalar_select %p68_p7, %s778_s20, %s70_s27  }
  0x10   : > { %s1030_s6 = scalar_select %p880_p9, 1, 0 }
  0x11   : > { %p887_p11 = por %p178_p10, %p83_p3  ;;  %s217_s9 = sand.u32 1, %s778_s20  }
  0x12   : > { %s578_s10 = sshll.u32 %s217_s9, 2  ;;  %s579_s11 = sshll.u32 %s786_s22, 6 }
  0x13   : > { %s1031_s8 = scalar_select %p887_p11, 1, 0 }
  0x14   : > { %s898_s14 = scalar_lea.hbm %s1022_s1, %s579_s11  ;;  %s221_s15 = scalar_lea.vmem [#allocation2], %s578_s10 }
  0x15   : > { %s229_s16 = sshll.u32 %s221_s15, 4  ;;  %p904_p0 = pnand %p622_p13, %p870_p4  ;;  %s900_s16 = int_to_ptr.vmem [resolvable:$true] %s229_s16 }
  0x16   : > { %s218_s24 = scalar_lea.sflag [#allocation3], %s217_s9  ;;  %s678_s25 = scalar_lea.hbm %s898_s14, 64 }
  0x17   : > { %p679_p3 = scmp.ne.s32.totalorder %s898_s14, %s678_s25  ;;  %p680_p5 = pneg %p904_p0 }
  0x18   : > { %s683_s28 = scalar_lea.hbm %s1022_s1, 128  ;;  %p684_p4 = scmp.lt.u32.totalorder %s898_s14, %s1022_s1 }
  0x19   : > { %p681_p6 = pnand %p680_p5, %p679_p3  ;;  %p685_p10 = scmp.lt.u32.totalorder %s683_s28, %s678_s25 }
  0x1a   : > { %p687_p12 = scmp.lt.u32.totalorder %s678_s25, %s898_s14 }
  0x1b   : > { %p682_p7 = pneg %p681_p6  ;;  %p686_p13 = por %p685_p10, %p684_p4 }
  0x1d   : > { %p688_p1 = por %p687_p12, %p686_p13 }
  0x1f   : > { %p689_p2 = pnand %p688_p1, %p682_p7 }
  0x21   : > { %692 = shalt.err (!%p689_p2)
}
  0x22   : > { %s693_s9 = scalar_lea.vmem %s900_s16, 64  ;;  %s792_s12 = smov [#allocation2]  }
  0x23   : > { %p694_p3 = scmp.ne.s32.totalorder %s900_s16, %s693_s9  ;;  %s698_s13 = sshll.u32 %s792_s12, 4  ;;  %s699_s13 = int_to_ptr.vmem [resolvable:$false] %s698_s13 }
  0x24   : > { %s700_s15 = scalar_lea.vmem %s699_s13, 128  ;;  %p701_p9 = scmp.lt.s32.totalorder %s900_s16, %s699_s13 }
  0x25   : > { %p696_p6 = pnand %p694_p3, %p680_p5  ;;  %p702_p4 = scmp.lt.s32.totalorder %s700_s15, %s693_s9 }
  0x27   : > { %p697_p11 = pneg %p696_p6  ;;  %p703_p10 = por %p702_p4, %p701_p9 }
  0x29   : > { %p704_p12 = pnand %p703_p10, %p697_p11 }
  0x2b   : > { %707 = shalt.err (!%p704_p12)
}
  0x2c   : > { %617 = dma.hbm_to_vmem [thread:$0]  (!%p904_p0), %s898_s14, 64, %s900_s16, %s218_s24  }
  0x2d   : > { %p1033_p1 = scmp.lt.s32.totalorder %s790_s23, 3  ;;  %p1034_p2 = scmp.ge.s32.totalorder %s790_s23, 1 }
  0x2f   : > { %p235_p5 = pnand %p1034_p2, %p1033_p1 }
  0x30   : > { %s940_s25 = sand.u32 (!%p235_p5), 1, %s774_s19  }
  0x31   : > { %238 = sbr.rel (%p235_p5) target bundleno = 294 (0x126), region = 40  ;;  %s581_s27 = sshll.u32 (!%p235_p5), %s940_s25, 2 }
  0x32   : > { %s241_s29 = scalar_lea.sflag (!%p235_p5), [#allocation3], %s940_s25  ;;  %s244_s28 = scalar_lea.vmem (!%p235_p5), [#allocation2], %s581_s27 }
  0x38   : > { %761 = dma.done.wait (%p876_p8), %s241_s29, 64  }
  0x39   : > { %763 = vsyncadd (%p876_p8), %s241_s29, 4294967232  ;;  %p278_p9 = scmp.lt.s32.totalorder %s782_s21, 1  ;;  %v793_v0 = vmov 0.0   ;;  %vm794_vm0 = vmmov 0   ;;  %v795_v1 = vmov 0   ;;  %vm299_vm1 = vcmask 1043456  }
  0x3a   : > { %600 = vmatprep.subr.mxu0 %v793_v0  ;;  %605 = vmatprep.subr.mxu1 %v793_v0  ;;  %vm295_vm2 = vcmask 31744   ;;  %v288_v3 = vld [vmem:[%s244_s28] sm:$0xf]  ;;  %s582_s28 = sshll.u32 %s940_s25, 3  ;;  %s595_s17 = sshll.u32 %s782_s21, 7  ;;  %vm373_vm3 = vcmask 519168  }
  0x3b   : > { %s279_s14 = scalar_select %p278_p9, %s782_s21, 1  ;;  %602 = vmatprep.mubr.msk.f32.mxu0 %vm794_vm0, %v793_v0  ;;  %607 = vmatprep.mubr.msk.f32.mxu1 %vm794_vm0, %v793_v0  ;;  %v285_v4 = vld [vmem:[%s1023_s2] sm:$0xf]  ;;  %v586_v7 = vld [vmem:[%s1025_s4 + $0x4] sm:$0xf] }
  0x3c   : > { %677 = vset.pattern.permute.xlu0 %v795_v1  ;;  %606 = vmatpush3.msk.msra.mxu1 %vm299_vm1, %v288_v3  ;;  %v287_v5 = vld [vmem:[%s1024_s3] sm:$0xf]  ;;  %s972_s30 = scalar_lea.hbm %s1026_s5, %s595_s17  ;;  %s461_s21 = scalar_lea.sflag [#allocation4], %s940_s25 }
  0x3d   : > { %s583_s16 = sshll.u32 %s279_s14, 2  ;;  %v289_v6 = vld [vmem:[%s1025_s4] sm:$0xf]  ;;  %608 = vmatmul.mubr.msk.f32.vlgmr.msra.gmra.mrb[0].mxu1 %vm295_vm2, %v287_v5  ;;  %s277_s14 = scalar_lea.vmem [#allocation5], %s582_s28 }
  0x3e   : > { %s284_s10 = scalar_lea.vmem %s1021_s0, %s583_s16  ;;  %292 = vperm.xlu0 %677, %v289_v6   ;;  %s475_s16 = sshll.u32 %s277_s14, 4  ;;  %s967_s16 = int_to_ptr.vmem [resolvable:$true] %s475_s16 }
  0x3f   : > { %v286_v2 = vld [vmem:[%s284_s10] sm:$0xf]  ;;  %s708_s11 = scalar_lea.vmem %s967_s16, 128  ;;  %p1035_p11 = scmp.ne.s32.totalorder %s1030_s6, 0 }
  0x40   : > { %601 = vmatpush3.msk.msra.mxu0 %vm299_vm1, %v286_v2  ;;  %p709_p8 = scmp.ne.s32.totalorder %s967_s16, %s708_s11  ;;  %s796_s9 = smov [#allocation5]  }
  0x41   : > { %603 = vmatmul.mubr.msk.f32.vlgmr.msra.gmra.mrb[0].mxu0 %vm295_vm2, %v285_v4  ;;  %s712_s12 = sshll.u32 %s796_s9, 4  ;;  %s713_s12 = int_to_ptr.vmem [resolvable:$false] %s712_s12 }
  0x42   : > { %379 = vperm.xlu0 %677, %v586_v7   ;;  %p710_p0 = pnand %p709_p8, %p1035_p11  ;;  %s714_s13 = scalar_lea.vmem %s713_s12, 256 }
  0x43   : > { %p715_p13 = scmp.lt.s32.totalorder %s967_s16, %s713_s12  ;;  %p716_p3 = scmp.lt.s32.totalorder %s714_s13, %s708_s11 }
  0x44   : > { %p711_p7 = pneg %p710_p0 }
  0x45   : > { %p717_p6 = por %p716_p3, %p715_p13 }
  0x47   : > { %p718_p4 = pnand %p717_p6, %p711_p7 }
  0xbd   : > { %v293_v8 = vpop.permute.xlu0 %292 }
  0xc1   : > { %v380_v9 = vpop.permute.xlu0 %379 }
 0x110   : > { %v454_v11 = vpop.f32.mrb[0].mxu1 }
 0x111   : > { %v455_v13 = vadd.f32 %v454_v11, %v380_v9  ;;  %v609_v15 = vpop.f32.mrb[1].mxu1 }
 0x113   : > { %589 = vst.msk [vmem:[%s277_s14 + $0x4] sm:$0xf] %vm373_vm3, %v455_v13 }
 0x114   : > { %v369_v10 = vpop.f32.mrb[0].mxu0 }
 0x115   : > { %v370_v12 = vadd.f32 %v369_v10, %v293_v8  ;;  %v604_v14 = vpop.f32.mrb[1].mxu0 }
 0x117   : > { %374 = vst.msk [vmem:[%s277_s14] sm:$0xf] %vm373_vm3, %v370_v12 }
 0x118   : > { %721 = shalt.err (!%p718_p4)
}
 0x119   : > { %s722_s15 = scalar_lea.hbm %s972_s30, 128  ;;  %s726_s28 = scalar_lea.hbm %s1026_s5, 256 }
 0x11a   : > { %p723_p10 = scmp.ne.s32.totalorder %s972_s30, %s722_s15  ;;  %p727_p2 = scmp.lt.u32.totalorder %s972_s30, %s1026_s5 }
 0x11b   : > { %p728_p5 = scmp.lt.u32.totalorder %s726_s28, %s722_s15  ;;  %p730_p8 = scmp.lt.u32.totalorder %s722_s15, %s972_s30 }
 0x11c   : > { %p724_p12 = pnand %p723_p10, %p1035_p11 }
 0x11d   : > { %p729_p9 = por %p728_p5, %p727_p2 }
 0x11e   : > { %p725_p1 = pneg %p724_p12 }
 0x11f   : > { %p731_p0 = por %p730_p8, %p729_p9 }
 0x121   : > { %p732_p7 = pnand %p731_p0, %p725_p1 }
 0x123   : > { %735 = shalt.err (!%p732_p7)
}
 0x124   : > { %s797_s24 = smov 64   ;;  %s798_s10 = smov 4  }
 0x125   : > { %612 = dma.vmem_to_hbm [thread:$0]  (%p1035_p11), %s967_s16, 128, %s972_s30, %s461_s21, %s797_s24, %s797_s24, %s798_s10  }
 0x126 PF: > { %s490_s11 = sand.u32 1, %s770_s18   ;;  %p1036_p13 = scmp.ne.s32.totalorder %s1031_s8, 0 }
 0x127   : > { %p1037_p3 = scmp.ge.s32.totalorder %s790_s23, 2  ;;  %s491_s9 = scalar_lea.sflag [#allocation4], %s490_s11 }
 0x129   : > { %p619_p6 = pnand %p1037_p3, %p1036_p13 }
 0x12b   : > { %765 = dma.done.wait (!%p619_p6), %s491_s9, 128  }
 0x12c   : > { %767 = vsyncadd (!%p619_p6), %s491_s9, 4294967168  ;;  %s21_s23 = sadd.s32 1, %s790_s23   ;;  %s1038_s18 = smov %s774_s19 }
 0x12d   : > { %p18_p4 = scmp.ge.s32.totalorder %s21_s23, 4   ;;  %s1039_s19 = smov %s778_s20 }
 0x12e   : > { %s1040_s20 = smov %s885_s7  ;;  %s1041_s21 = smov %s786_s22 }
 0x12f   : > { %s1042_s22 = smov %s1044_s26  ;;  %20 = sbr.rel (!%p18_p4) target bundleno = 6 (0x6), region = 90 }
 0x136   :  { %496 = vsyncpa [#allocation3], 1 }
 0x137   :  { %498 = vsyncpa [#allocation3 + $0x1], 1 }
 0x138   :  { %499 = vsyncpa [#allocation4], 1 }
 0x139   :  { %501 = vsyncpa [#allocation4 + $0x1], 1 }

</bundles_post_ra>
